<compile_context>
chip_gen: v7x
topology: tpu7x:2x2x1
jax: 0.10.0
libtpu: 0.0.40
codegen_flags: <defaults>
</compile_context>

<pallas_src>
import jax
import jax.numpy as jnp
from jax.experimental import pallas as pl
from jax.experimental.pallas import tpu as pltpu


def _round_up(n, m):
    return ((n + m - 1) // m) * m


def mlp_kernel(x_ref, w1_ref, b1_ref, w2_ref, b2_ref, o_ref):
    # fc1: cast activations to the weights' compute dtype (bf16 by default)
    # inside the kernel; MXU accumulates in f32.
    x = x_ref[...].astype(w1_ref.dtype)
    h = jnp.dot(x, w1_ref[...], preferred_element_type=jnp.float32)
    h = h + b1_ref[...]                                   # bias add in f32
    # fc2 (bf16 operands, f32 accumulation)
    out = jnp.dot(h.astype(w2_ref.dtype), w2_ref[...],
                  preferred_element_type=jnp.float32)
    out = out + b2_ref[...]
    # ReLU applied AFTER fc2 — exactly the module's forward:
    #   out = fc1(x); out = fc2(out); out = relu(out)
    o_ref[...] = jnp.maximum(out, 0.0).astype(o_ref.dtype)


def prepare_params(w1, b1, w2, b2, *, compute_dtype=jnp.bfloat16):
    """One-time weight prep; call once and reuse across forward calls.

    w1: [IN, H], w2: [H, C]  (pre-transposed [in, out] vs PyTorch's [out, in])
    b1: [H] or [1, H], b2: [C] or [1, C]
    Only the hidden dim is padded to a 128 multiple (zero padding is exact).
    Weights are cast to `compute_dtype` (set jnp.float32 to disable the bf16
    precision trade-off); biases stay f32 (added after f32 MXU accumulation).
    """
    IN, H = w1.shape
    C = w2.shape[1]
    H_p = _round_up(H, 128)

    b1 = jnp.asarray(b1, jnp.float32).reshape(1, H)       # accept (H,) or (1,H)
    b2 = jnp.asarray(b2, jnp.float32).reshape(1, C)

    w1p = jnp.zeros((IN, H_p), compute_dtype).at[:, :H].set(w1.astype(compute_dtype))
    b1p = jnp.zeros((1, H_p), jnp.float32).at[:, :H].set(b1)
    w2p = jnp.zeros((H_p, C), compute_dtype).at[:H, :].set(w2.astype(compute_dtype))
    return w1p, b1p, w2p, b2


def neural_net_forward(x, w1p, b1p, w2p, b2, *, block_batch=1024):
    """x: [B, IN] f32; (w1p, b1p, w2p, b2) from prepare_params(). Returns [B, C] f32."""
    B, IN = x.shape
    assert w1p.shape[0] == IN
    H_p = w1p.shape[1]
    C = w2p.shape[1]

    # Batch tile: large enough to fill the MXU and amortize the ~0.35 us
    # per-grid-step overhead, never larger than the (8-rounded) batch.
    TB = min(block_batch, _round_up(B, 8))
    # Keep >= 2 grid steps when the batch allows, so the "parallel" batch
    # axis can shard across v7x's two TensorCores.
    if B > 16 and pl.cdiv(B, TB) < 2:
        TB = _round_up(pl.cdiv(B, 2), 8)
    grid = (pl.cdiv(B, TB),)   # ragged last tile is masked by Pallas

    return pl.pallas_call(
        mlp_kernel,
        out_shape=jax.ShapeDtypeStruct((B, C), jnp.float32),
        grid=grid,
        in_specs=[
            # x streams per batch tile; last block dim == full array dim (784),
            # so no K padding and no wrapper-side copy/cast is needed.
            pl.BlockSpec((TB, IN), lambda i: (i, 0)),
            pl.BlockSpec((IN, H_p), lambda i: (0, 0)),   # w1: VMEM-resident
            pl.BlockSpec((1, H_p), lambda i: (0, 0)),    # b1
            pl.BlockSpec((H_p, C), lambda i: (0, 0)),    # w2
            pl.BlockSpec((1, C), lambda i: (0, 0)),      # b2
        ],
        # Narrow (TB, C) output block: last dim == full array dim, so only
        # the real class columns hit HBM (no padded slab, no wrapper slice).
        out_specs=pl.BlockSpec((TB, C), lambda i: (i, 0)),
        compiler_params=pltpu.CompilerParams(
            dimension_semantics=("parallel",),
            vmem_limit_bytes=32 * 1024 * 1024,   # v5e default is 16 MiB
        ),
    )(x, w1p, b1p, w2p, b2)


def init_params(key, input_size, hidden_size, num_classes):
    """Deterministic init mirroring nn.Linear's U(-1/sqrt(fan_in), 1/sqrt(fan_in))."""
    k1, k2, k3, k4 = jax.random.split(key, 4)
    bound1 = 1.0 / jnp.sqrt(input_size)
    bound2 = 1.0 / jnp.sqrt(hidden_size)
    # stored as [in, out] (transposed relative to PyTorch's [out, in])
    w1 = jax.random.uniform(k1, (input_size, hidden_size), jnp.float32, -bound1, bound1)
    b1 = jax.random.uniform(k2, (hidden_size,), jnp.float32, -bound1, bound1)
    w2 = jax.random.uniform(k3, (hidden_size, num_classes), jnp.float32, -bound2, bound2)
    b2 = jax.random.uniform(k4, (num_classes,), jnp.float32, -bound2, bound2)
    return w1, b1, w2, b2


if __name__ == "__main__":
    # Shapes implied by the module: input_size=784, hidden_size=500 (default
    # flor.arg), num_classes=10.  Small batches for the smoke test.
    input_size, hidden_size, num_classes = 784, 500, 10

    key = jax.random.PRNGKey(0)
    kx, kp = jax.random.split(key)
    w1, b1, w2, b2 = init_params(kp, input_size, hidden_size, num_classes)

    # One-time weight prep (hoisted out of the per-call path).
    params_bf16 = prepare_params(w1, b1, w2, b2)

    for batch in (8, 32):   # batch=32 exercises the 2-step "parallel" grid
        x = jax.random.normal(jax.random.fold_in(kx, batch),
                              (batch, input_size), jnp.float32)
        out = jax.block_until_ready(neural_net_forward(x, *params_bf16))
        assert out.shape == (batch, num_classes)

        # Tight check vs a reference emulating the kernel's bf16-input /
        # f32-accumulate arithmetic.
        x_bf = x.astype(jnp.bfloat16).astype(jnp.float32)
        w1_bf = w1.astype(jnp.bfloat16).astype(jnp.float32)
        w2_bf = w2.astype(jnp.bfloat16).astype(jnp.float32)
        h_ref = (x_bf @ w1_bf + b1).astype(jnp.bfloat16).astype(jnp.float32)
        ref_bf16 = jnp.maximum(h_ref @ w2_bf + b2, 0.0)
        assert jnp.allclose(out, ref_bf16, atol=1e-3, rtol=1e-3)

        # Loose check vs the pure-f32 forward (bf16 cast noise only).
        ref_f32 = jnp.maximum((x @ w1 + b1) @ w2 + b2, 0.0)
        assert jnp.allclose(out, ref_f32, atol=5e-2, rtol=5e-2)

    # Full-precision path (bf16 trade-off gated behind compute_dtype flag).
    params_f32 = prepare_params(w1, b1, w2, b2, compute_dtype=jnp.float32)
    x = jax.random.normal(kx, (8, input_size), jnp.float32)
    out_f32 = jax.block_until_ready(neural_net_forward(x, *params_f32))
    ref_f32 = jnp.maximum((x @ w1 + b1) @ w2 + b2, 0.0)
    assert jnp.allclose(out_f32, ref_f32, atol=2e-2, rtol=2e-2)

    print("KERNEL_OK")
</pallas_src>

<mosaic_0001>
module attributes {stable_mosaic.version = 11 : i64} {
  func.func @mlp_kernel(%arg0: i32, %arg1: memref<8x784xf32, #tpu.memory_space<vmem>>, %arg2: memref<784x512xbf16, #tpu.memory_space<vmem>>, %arg3: memref<1x512xf32, #tpu.memory_space<vmem>>, %arg4: memref<512x10xbf16, #tpu.memory_space<vmem>>, %arg5: memref<1x10xf32, #tpu.memory_space<vmem>>, %arg6: memref<8x10xf32, #tpu.memory_space<vmem>>) attributes {dimension_semantics = [#tpu.dimension_semantics<parallel>], iteration_bounds = array<i64: 1>, scalar_prefetch = 0 : i64, scratch_operands = 0 : i64, tpu.core_type = #tpu.core_type<tc>, window_params = [{transform_indices = @transform_0, window_bounds = array<i64: 8, 784>}, {pipeline_mode = #tpu.pipeline_mode<synchronous>, transform_indices = @transform_1, window_bounds = array<i64: 784, 512>}, {pipeline_mode = #tpu.pipeline_mode<synchronous>, transform_indices = @transform_2, window_bounds = array<i64: 1, 512>}, {pipeline_mode = #tpu.pipeline_mode<synchronous>, transform_indices = @transform_3, window_bounds = array<i64: 512, 10>}, {pipeline_mode = #tpu.pipeline_mode<synchronous>, transform_indices = @transform_4, window_bounds = array<i64: 1, 10>}, {transform_indices = @transform_5, window_bounds = array<i64: 8, 10>}]} {
    %c0 = arith.constant 0 : index
    %c0_0 = arith.constant 0 : index
    %0 = vector.load %arg1[%c0, %c0_0] : memref<8x784xf32, #tpu.memory_space<vmem>>, vector<8x784xf32>
    %1 = arith.truncf %0 : vector<8x784xf32> to vector<8x784xbf16>
    %c0_1 = arith.constant 0 : index
    %c0_2 = arith.constant 0 : index
    %2 = vector.load %arg2[%c0_1, %c0_2] : memref<784x512xbf16, #tpu.memory_space<vmem>>, vector<784x512xbf16>
    %cst = arith.constant dense<0.000000e+00> : vector<8x512xf32>
    %3 = tpu.matmul %1, %2, %cst {dimension_numbers = #tpu.dot_dimension_numbers<[1], [0], [0], [1], [0, 0, 1, 1], [], []>} : vector<8x784xbf16>, vector<784x512xbf16>, vector<8x512xf32> -> vector<8x512xf32>
    %c0_3 = arith.constant 0 : index
    %c0_4 = arith.constant 0 : index
    %4 = vector.load %arg3[%c0_3, %c0_4] : memref<1x512xf32, #tpu.memory_space<vmem>>, vector<1x512xf32>
    %5 = vector.broadcast %4 : vector<1x512xf32> to vector<8x512xf32>
    %6 = arith.addf %3, %5 : vector<8x512xf32>
    %7 = arith.truncf %6 : vector<8x512xf32> to vector<8x512xbf16>
    %c0_5 = arith.constant 0 : index
    %c0_6 = arith.constant 0 : index
    %8 = vector.load %arg4[%c0_5, %c0_6] : memref<512x10xbf16, #tpu.memory_space<vmem>>, vector<512x10xbf16>
    %cst_7 = arith.constant dense<0.000000e+00> : vector<8x10xf32>
    %9 = tpu.matmul %7, %8, %cst_7 {dimension_numbers = #tpu.dot_dimension_numbers<[1], [0], [0], [1], [0, 0, 1, 1], [], []>} : vector<8x512xbf16>, vector<512x10xbf16>, vector<8x10xf32> -> vector<8x10xf32>
    %c0_8 = arith.constant 0 : index
    %c0_9 = arith.constant 0 : index
    %10 = vector.load %arg5[%c0_8, %c0_9] : memref<1x10xf32, #tpu.memory_space<vmem>>, vector<1x10xf32>
    %11 = vector.broadcast %10 : vector<1x10xf32> to vector<8x10xf32>
    %12 = arith.addf %9, %11 : vector<8x10xf32>
    %cst_10 = arith.constant 0.000000e+00 : f32
    %13 = vector.broadcast %cst_10 : f32 to vector<8x10xf32>
    %14 = arith.maximumf %12, %13 : vector<8x10xf32>
    %c0_11 = arith.constant 0 : index
    %c0_12 = arith.constant 0 : index
    %15 = vector.load %arg6[%c0_11, %c0_12] : memref<8x10xf32, #tpu.memory_space<vmem>>, vector<8x10xf32>
    tpu.vector_store %arg6[%c0_11, %c0_12], %14 {strides = array<i32>} : memref<8x10xf32, #tpu.memory_space<vmem>>, vector<8x10xf32>,
    return
  }
  func.func @transform_0(%arg0: i32) -> (i32, i32) {
    %c0_i32 = arith.constant 0 : i32
    %c0_i32_0 = arith.constant 0 : i32
    return %arg0, %c0_i32 : i32, i32
  }
  func.func @transform_1(%arg0: i32) -> (i32, i32) {
    %c0_i32 = arith.constant 0 : i32
    %c0_i32_0 = arith.constant 0 : i32
    %c0_i32_1 = arith.constant 0 : i32
    return %c0_i32, %c0_i32_0 : i32, i32
  }
  func.func @transform_2(%arg0: i32) -> (i32, i32) {
    %c0_i32 = arith.constant 0 : i32
    %c0_i32_0 = arith.constant 0 : i32
    %c0_i32_1 = arith.constant 0 : i32
    return %c0_i32, %c0_i32_0 : i32, i32
  }
  func.func @transform_3(%arg0: i32) -> (i32, i32) {
    %c0_i32 = arith.constant 0 : i32
    %c0_i32_0 = arith.constant 0 : i32
    %c0_i32_1 = arith.constant 0 : i32
    return %c0_i32, %c0_i32_0 : i32, i32
  }
  func.func @transform_4(%arg0: i32) -> (i32, i32) {
    %c0_i32 = arith.constant 0 : i32
    %c0_i32_0 = arith.constant 0 : i32
    %c0_i32_1 = arith.constant 0 : i32
    return %c0_i32, %c0_i32_0 : i32, i32
  }
  func.func @transform_5(%arg0: i32) -> (i32, i32) {
    %c0_i32 = arith.constant 0 : i32
    %c0_i32_0 = arith.constant 0 : i32
    return %arg0, %c0_i32 : i32, i32
  }
}

</mosaic_0001>

<bundles_post_ra>
// kernel: tpu_custom_call.1
= control target key start
LH: loop header
LB: loop body
LE: loop exit
PB: predicated region body
PF: predicated region fallthrough
CT: control target
= control target key end

     0   :  { %10 = vsyncpa [#allocation3], 0  ;;  %s2809_s0 = inlined_call_operand.vmem [shape: f32[8,784], index: 0, kind: input, shape index: {}]   ;;  %s2810_s1 = inlined_call_operand.hbm [shape: bf16[784,512], index: 1, kind: input, shape index: {}]   ;;  %s2811_s2 = inlined_call_operand.vmem [shape: f32[1,512], index: 2, kind: input, shape index: {}]   ;;  %s2812_s3 = inlined_call_operand.vmem [shape: bf16[512,10], index: 3, kind: input, shape index: {}]   ;;  %s2813_s4 = inlined_call_operand.vmem [shape: f32[1,10], index: 4, kind: input, shape index: {}]   ;;  %s2814_s5 = inlined_call_operand.hbm [shape: f32[8,10], index: 5, kind: output, shape index: {}]  }
   0x1   :  { %11 = vsyncpa [#allocation4], 0  ;;  %s2627_s18 = smov [#allocation2]   ;;  %s2579_s22 = scalar_lea.hbm %s2810_s1, 25088 }
   0x2   :  { %s19_s19 = sshll.u32 %s2627_s18, 4  ;;  %p2580_p0 = scmp.ne.s32.totalorder %s2810_s1, %s2579_s22  ;;  %s20_s19 = int_to_ptr.vmem [resolvable:$true] %s19_s19 }
   0x3   :  { %p2583_p1 = scmp.lt.u32.totalorder %s2579_s22, %s2810_s1 }
   0x5   :  { %p2585_p2 = pnand %p2583_p1, %p2580_p0 }
   0x7   :  { %2588 = shalt.err (!%p2585_p2)
}
   0x8   :  { %s2589_s27 = scalar_lea.vmem %s20_s19, 25088  ;;  %p2594_p4 = scmp.lt.s32.totalorder %s20_s19, %s20_s19 }
   0x9   :  { %p2590_p3 = scmp.ne.s32.totalorder %s20_s19, %s2589_s27  ;;  %p2595_p5 = scmp.lt.s32.totalorder %s2589_s27, %s2589_s27 }
   0xb   :  { %p2596_p6 = por %p2595_p5, %p2594_p4 }
   0xd   :  { %p2597_p7 = pnand %p2596_p6, %p2590_p3 }
   0xf   :  { %2600 = shalt.err (!%p2597_p7)
}
  0x10   :  { %s2628_s28 = smov 256   ;;  %s2629_s29 = smov 16  }
  0x11   :  { %25 = dma.hbm_to_vmem [thread:$0]  %s2810_s1, 25088, %s20_s19, [#allocation3], %s2628_s28, %s2628_s28, %s2629_s29  }
  0x12   :  { %2623 = dma.done.wait [#allocation3], 25088  }
  0x13   :  { %2624 = vsyncadd [#allocation3], 4294942208  ;;  %v2253_v0 = vld [vmem:[#allocation2 + $0x4] ss:$16 sps:$4 sm:$0xff]   ;;  %v2255_v1 = vld [vmem:[#allocation2 + $0xc] ss:$16 sps:$4 sm:$0xff]  }
  0x14   :  { %1252 = vmatprep.subr.bf16.mxu0 %v2253_v0  ;;  %v2257_v2 = vld [vmem:[#allocation2] ss:$16 sps:$4 sm:$0xff]   ;;  %v2258_v3 = vld [vmem:[#allocation2 + $0x8] ss:$16 sps:$4 sm:$0xff]   ;;  %1416 = vmatprep.subr.bf16.mxu1 %v2255_v1  ;;  %v2259_v4 = vld [vmem:[#allocation2 + $0x24] ss:$16 sps:$4 sm:$0xff]  }
  0x15   :  { %1253 = vmatpush1.bf16.msra.mxu0 %v2257_v2  ;;  %1417 = vmatpush1.bf16.msra.mxu1 %v2258_v3  ;;  %v2261_v5 = vld [vmem:[#allocation2 + $0x2c] ss:$16 sps:$4 sm:$0xff]   ;;  %v2263_v6 = vld [vmem:[#allocation2 + $0x20] ss:$16 sps:$4 sm:$0xff]   ;;  %v2264_v7 = vld [vmem:[#allocation2 + $0x28] ss:$16 sps:$4 sm:$0xff]  }
  0x16   :  { %1254 = vmatprep.subr.bf16.mxu0 %v2259_v4  ;;  %1418 = vmatprep.subr.bf16.mxu1 %v2261_v5  ;;  %v2265_v8 = vld [vmem:[#allocation2 + $0x44] ss:$16 sps:$4 sm:$0xff]   ;;  %v2267_v9 = vld [vmem:[#allocation2 + $0x4c] ss:$16 sps:$4 sm:$0xff]   ;;  %v2269_v10 = vld [vmem:[#allocation2 + $0x40] ss:$16 sps:$4 sm:$0xff]  }
  0x17   :  { %v2270_v11 = vld [vmem:[#allocation2 + $0x48] ss:$16 sps:$4 sm:$0xff]   ;;  %v2271_v12 = vld [vmem:[#allocation2 + $0x64] ss:$16 sps:$4 sm:$0xff]   ;;  %v2273_v13 = vld [vmem:[#allocation2 + $0x6c] ss:$16 sps:$4 sm:$0xff]  }
  0x18   :  { %v2275_v14 = vld [vmem:[#allocation2 + $0x60] ss:$16 sps:$4 sm:$0xff]   ;;  %v2276_v15 = vld [vmem:[#allocation2 + $0x68] ss:$16 sps:$4 sm:$0xff]   ;;  %v2277_v16 = vld [vmem:[#allocation2 + $0x84] ss:$16 sps:$4 sm:$0xff]  }
  0x19   :  { %1255 = vmatpush1.bf16.msra.mxu0 %v2263_v6  ;;  %1419 = vmatpush1.bf16.msra.mxu1 %v2264_v7  ;;  %v2279_v17 = vld [vmem:[#allocation2 + $0x8c] ss:$16 sps:$4 sm:$0xff]   ;;  %v2281_v18 = vld [vmem:[#allocation2 + $0x80] ss:$16 sps:$4 sm:$0xff]   ;;  %v2282_v19 = vld [vmem:[#allocation2 + $0x88] ss:$16 sps:$4 sm:$0xff]  }
  0x1a   :  { %1256 = vmatprep.subr.bf16.mxu0 %v2265_v8  ;;  %1420 = vmatprep.subr.bf16.mxu1 %v2267_v9  ;;  %v2283_v20 = vld [vmem:[#allocation2 + $0xa4] ss:$16 sps:$4 sm:$0xff]   ;;  %v2285_v21 = vld [vmem:[#allocation2 + $0xac] ss:$16 sps:$4 sm:$0xff]   ;;  %v2287_v22 = vld [vmem:[#allocation2 + $0xa0] ss:$16 sps:$4 sm:$0xff]  }
  0x1b   :  { %v2288_v23 = vld [vmem:[#allocation2 + $0xa8] ss:$16 sps:$4 sm:$0xff]   ;;  %v2289_v24 = vld [vmem:[#allocation2 + $0xc4] ss:$16 sps:$4 sm:$0xff]   ;;  %v2291_v25 = vld [vmem:[#allocation2 + $0xcc] ss:$16 sps:$4 sm:$0xff]  }
  0x1c   :  { %v2293_v26 = vld [vmem:[#allocation2 + $0xc0] ss:$16 sps:$4 sm:$0xff]   ;;  %v2294_v27 = vld [vmem:[#allocation2 + $0xc8] ss:$16 sps:$4 sm:$0xff]   ;;  %v2295_v28 = vld [vmem:[#allocation2 + $0xe4] ss:$16 sps:$4 sm:$0xff]  }
  0x1d   :  { %1257 = vmatpush1.bf16.msra.mxu0 %v2269_v10  ;;  %1421 = vmatpush1.bf16.msra.mxu1 %v2270_v11  ;;  %v2297_v29 = vld [vmem:[#allocation2 + $0xec] ss:$16 sps:$4 sm:$0xff]   ;;  %v2299_v30 = vld [vmem:[#allocation2 + $0xe0] ss:$16 sps:$4 sm:$0xff]   ;;  %v2300_v31 = vld [vmem:[#allocation2 + $0xe8] ss:$16 sps:$4 sm:$0xff]  }
  0x1e   :  { %1258 = vmatprep.subr.bf16.mxu0 %v2271_v12  ;;  %1422 = vmatprep.subr.bf16.mxu1 %v2273_v13  ;;  %v2301_v32 = vld [vmem:[#allocation2 + $0x104] ss:$16 sps:$4 sm:$0xff]   ;;  %v2303_v33 = vld [vmem:[#allocation2 + $0x10c] ss:$16 sps:$4 sm:$0xff]   ;;  %v2305_v34 = vld [vmem:[#allocation2 + $0x100] ss:$16 sps:$4 sm:$0xff]  }
  0x1f   :  { %v2306_v35 = vld [vmem:[#allocation2 + $0x108] ss:$16 sps:$4 sm:$0xff]   ;;  %v2307_v36 = vld [vmem:[#allocation2 + $0x124] ss:$16 sps:$4 sm:$0xff]   ;;  %v2309_v37 = vld [vmem:[#allocation2 + $0x12c] ss:$16 sps:$4 sm:$0xff]  }
  0x20   :  { %v2311_v38 = vld [vmem:[#allocation2 + $0x120] ss:$16 sps:$4 sm:$0xff]   ;;  %v2312_v39 = vld [vmem:[#allocation2 + $0x128] ss:$16 sps:$4 sm:$0xff]   ;;  %v2313_v40 = vld [vmem:[#allocation2 + $0x144] ss:$16 sps:$4 sm:$0xff]  }
  0x21   :  { %1259 = vmatpush1.bf16.msra.mxu0 %v2275_v14  ;;  %1423 = vmatpush1.bf16.msra.mxu1 %v2276_v15  ;;  %v2315_v41 = vld [vmem:[#allocation2 + $0x14c] ss:$16 sps:$4 sm:$0xff]   ;;  %v2317_v42 = vld [vmem:[#allocation2 + $0x140] ss:$16 sps:$4 sm:$0xff]   ;;  %v2318_v43 = vld [vmem:[#allocation2 + $0x148] ss:$16 sps:$4 sm:$0xff]  }
  0x22   :  { %1260 = vmatprep.subr.bf16.mxu0 %v2277_v16  ;;  %1424 = vmatprep.subr.bf16.mxu1 %v2279_v17  ;;  %v2319_v44 = vld [vmem:[#allocation2 + $0x164] ss:$16 sps:$4 sm:$0xff]   ;;  %v2321_v45 = vld [vmem:[#allocation2 + $0x16c] ss:$16 sps:$4 sm:$0xff]   ;;  %v2323_v47 = vld [vmem:[#allocation2 + $0x160] ss:$16 sps:$4 sm:$0xff]  }
  0x23   :  { %v37_v46 = vld [vmem:[%s2809_s0 + $0x8] sm:$0xff]  ;;  %v2325_v50 = vld [vmem:[#allocation2 + $0x184] ss:$16 sps:$4 sm:$0xff]   ;;  %v2329_v52 = vld [vmem:[#allocation2 + $0x180] ss:$16 sps:$4 sm:$0xff]   ;;  %vm1248_vm0 = vcmask 130048  }
  0x24   :  { %v44_v48 = vpack.c.bf16 %v37_v46, %v37_v46  ;;  %v2324_v49 = vld [vmem:[#allocation2 + $0x168] ss:$16 sps:$4 sm:$0xff]   ;;  %v2327_v51 = vld [vmem:[#allocation2 + $0x18c] ss:$16 sps:$4 sm:$0xff]   ;;  %v2331_v54 = vld [vmem:[#allocation2 + $0x1a4] ss:$16 sps:$4 sm:$0xff]  }
  0x25   :  { %1261 = vmatpush1.bf16.msra.mxu0 %v2281_v18  ;;  %1425 = vmatpush1.bf16.msra.mxu1 %v2282_v19  ;;  %v2330_v53 = vld [vmem:[#allocation2 + $0x188] ss:$16 sps:$4 sm:$0xff]   ;;  %v2333_v55 = vld [vmem:[#allocation2 + $0x1ac] ss:$16 sps:$4 sm:$0xff]   ;;  %v2335_v56 = vld [vmem:[#allocation2 + $0x1a0] ss:$16 sps:$4 sm:$0xff]  }
  0x26   :  { %1262 = vmatprep.subr.bf16.mxu0 %v2283_v20  ;;  %1426 = vmatprep.subr.bf16.mxu1 %v2285_v21  ;;  %v2336_v57 = vld [vmem:[#allocation2 + $0x1a8] ss:$16 sps:$4 sm:$0xff]   ;;  %v2337_v58 = vld [vmem:[#allocation2 + $0x1c4] ss:$16 sps:$4 sm:$0xff]   ;;  %v2339_v59 = vld [vmem:[#allocation2 + $0x1cc] ss:$16 sps:$4 sm:$0xff]  }
  0x27   :  { %1284 = vmatprep.mubr.bf16.mxu0 %v44_v48  ;;  %1448 = vmatprep.mubr.bf16.mxu1 %v44_v48  ;;  %v2341_v60 = vld [vmem:[#allocation2 + $0x1c0] ss:$16 sps:$4 sm:$0xff]   ;;  %v2342_v61 = vld [vmem:[#allocation2 + $0x1c8] ss:$16 sps:$4 sm:$0xff]   ;;  %v2343_v62 = vld [vmem:[#allocation2 + $0x1e4] ss:$16 sps:$4 sm:$0xff]  }
  0x28   :  { %v2345_v63 = vld [vmem:[#allocation2 + $0x1ec] ss:$16 sps:$4 sm:$0xff]   ;;  %v2347_v0 = vld [vmem:[#allocation2 + $0x1e0] ss:$16 sps:$4 sm:$0xff]   ;;  %v2348_v1 = vld [vmem:[#allocation2 + $0x1e8] ss:$16 sps:$4 sm:$0xff]  }
  0x29   :  { %1263 = vmatpush1.bf16.msra.mxu0 %v2287_v22  ;;  %1427 = vmatpush1.bf16.msra.mxu1 %v2288_v23  ;;  %v36_v2 = vld [vmem:[%s2809_s0] sm:$0xff]  ;;  %v2354_v4 = vld [vmem:[#allocation2 + $0x20c] ss:$16 sps:$4 sm:$0xff]   ;;  %v2352_v7 = vld [vmem:[#allocation2 + $0x208] ss:$16 sps:$4 sm:$0xff]   ;;  %vm1928_vm1 = vcmask 80896  }
  0x2a   :  { %1264 = vmatprep.subr.bf16.mxu0 %v2289_v24  ;;  %1428 = vmatprep.subr.bf16.mxu1 %v2291_v25  ;;  %v2351_v3 = vld [vmem:[#allocation2 + $0x204] ss:$16 sps:$4 sm:$0xff]   ;;  %v43_v5 = vpack.c.bf16 %v36_v2, %v36_v2  ;;  %v2349_v6 = vld [vmem:[#allocation2 + $0x200] ss:$16 sps:$4 sm:$0xff]   ;;  %v2360_v9 = vld [vmem:[#allocation2 + $0x22c] ss:$16 sps:$4 sm:$0xff]  }
  0x2b   :  { %v2357_v8 = vld [vmem:[#allocation2 + $0x224] ss:$16 sps:$4 sm:$0xff]   ;;  %v2355_v10 = vld [vmem:[#allocation2 + $0x220] ss:$16 sps:$4 sm:$0xff]   ;;  %v2358_v11 = vld [vmem:[#allocation2 + $0x228] ss:$16 sps:$4 sm:$0xff]  }
  0x2c   :  { %v2363_v12 = vld [vmem:[#allocation2 + $0x244] ss:$16 sps:$4 sm:$0xff]   ;;  %v2366_v13 = vld [vmem:[#allocation2 + $0x24c] ss:$16 sps:$4 sm:$0xff]   ;;  %v2361_v14 = vld [vmem:[#allocation2 + $0x240] ss:$16 sps:$4 sm:$0xff]  }
  0x2d   :  { %1265 = vmatpush1.bf16.msra.mxu0 %v2293_v26  ;;  %1429 = vmatpush1.bf16.msra.mxu1 %v2294_v27  ;;  %v2364_v15 = vld [vmem:[#allocation2 + $0x248] ss:$16 sps:$4 sm:$0xff]   ;;  %v2369_v16 = vld [vmem:[#allocation2 + $0x264] ss:$16 sps:$4 sm:$0xff]   ;;  %v2372_v17 = vld [vmem:[#allocation2 + $0x26c] ss:$16 sps:$4 sm:$0xff]  }
  0x2e   :  { %1266 = vmatprep.subr.bf16.mxu0 %v2295_v28  ;;  %1430 = vmatprep.subr.bf16.mxu1 %v2297_v29  ;;  %v2367_v18 = vld [vmem:[#allocation2 + $0x260] ss:$16 sps:$4 sm:$0xff]   ;;  %v2370_v19 = vld [vmem:[#allocation2 + $0x268] ss:$16 sps:$4 sm:$0xff]   ;;  %v2375_v20 = vld [vmem:[#allocation2 + $0x284] ss:$16 sps:$4 sm:$0xff]  }
  0x2f   :  { %v2378_v21 = vld [vmem:[#allocation2 + $0x28c] ss:$16 sps:$4 sm:$0xff]   ;;  %v2373_v22 = vld [vmem:[#allocation2 + $0x280] ss:$16 sps:$4 sm:$0xff]   ;;  %v2376_v23 = vld [vmem:[#allocation2 + $0x288] ss:$16 sps:$4 sm:$0xff]  }
  0x30   :  { %v2381_v24 = vld [vmem:[#allocation2 + $0x2a4] ss:$16 sps:$4 sm:$0xff]   ;;  %v2384_v25 = vld [vmem:[#allocation2 + $0x2ac] ss:$16 sps:$4 sm:$0xff]   ;;  %v2379_v26 = vld [vmem:[#allocation2 + $0x2a0] ss:$16 sps:$4 sm:$0xff]  }
  0x31   :  { %1267 = vmatpush1.bf16.msra.mxu0 %v2299_v30  ;;  %1431 = vmatpush1.bf16.msra.mxu1 %v2300_v31  ;;  %v2382_v27 = vld [vmem:[#allocation2 + $0x2a8] ss:$16 sps:$4 sm:$0xff]   ;;  %v2387_v28 = vld [vmem:[#allocation2 + $0x2c4] ss:$16 sps:$4 sm:$0xff]   ;;  %v2390_v29 = vld [vmem:[#allocation2 + $0x2cc] ss:$16 sps:$4 sm:$0xff]  }
  0x32   :  { %1268 = vmatprep.subr.bf16.mxu0 %v2301_v32  ;;  %1432 = vmatprep.subr.bf16.mxu1 %v2303_v33  ;;  %v39_v30 = vld [vmem:[%s2809_s0 + $0x18] sm:$0xff]  ;;  %v2385_v31 = vld [vmem:[#allocation2 + $0x2c0] ss:$16 sps:$4 sm:$0xff]   ;;  %v2411_v46 = vld [vmem:[#allocation2 + $0x344] ss:$16 sps:$4 sm:$0xff]  }
  0x33   :  { %v46_v32 = vpack.c.bf16 %v39_v30, %v39_v30  ;;  %v2388_v33 = vld [vmem:[#allocation2 + $0x2c8] ss:$16 sps:$4 sm:$0xff]   ;;  %v2409_v48 = vld [vmem:[#allocation2 + $0x340] ss:$16 sps:$4 sm:$0xff]   ;;  %v2441_v2 = vld [vmem:[#allocation2 + $0x3e4] ss:$16 sps:$4 sm:$0xff]  }
  0x34   :  { %v2477_v30 = vld [vmem:[#allocation2 + $0x4a4] ss:$16 sps:$4 sm:$0xff]  }
  0x35   :  { %1269 = vmatpush1.bf16.msra.mxu0 %v2305_v34  ;;  %1433 = vmatpush1.bf16.msra.mxu1 %v2306_v35  ;;  %v2393_v34 = vld [vmem:[#allocation2 + $0x2e4] ss:$16 sps:$4 sm:$0xff]   ;;  %v2396_v35 = vld [vmem:[#allocation2 + $0x2ec] ss:$16 sps:$4 sm:$0xff]  }
  0x36   :  { %1270 = vmatprep.subr.bf16.mxu0 %v2307_v36  ;;  %1434 = vmatprep.subr.bf16.mxu1 %v2309_v37  ;;  %v2391_v36 = vld [vmem:[#allocation2 + $0x2e0] ss:$16 sps:$4 sm:$0xff]   ;;  %v2394_v37 = vld [vmem:[#allocation2 + $0x2e8] ss:$16 sps:$4 sm:$0xff]  }
  0x39   :  { %1271 = vmatpush1.bf16.msra.mxu0 %v2311_v38  ;;  %1435 = vmatpush1.bf16.msra.mxu1 %v2312_v39  ;;  %v2399_v38 = vld [vmem:[#allocation2 + $0x304] ss:$16 sps:$4 sm:$0xff]   ;;  %v2402_v39 = vld [vmem:[#allocation2 + $0x30c] ss:$16 sps:$4 sm:$0xff]  }
  0x3a   :  { %1272 = vmatprep.subr.bf16.mxu0 %v2313_v40  ;;  %1436 = vmatprep.subr.bf16.mxu1 %v2315_v41  ;;  %v2397_v40 = vld [vmem:[#allocation2 + $0x300] ss:$16 sps:$4 sm:$0xff]   ;;  %v2400_v41 = vld [vmem:[#allocation2 + $0x308] ss:$16 sps:$4 sm:$0xff]  }
  0x3d   :  { %1273 = vmatpush1.bf16.msra.mxu0 %v2317_v42  ;;  %1437 = vmatpush1.bf16.msra.mxu1 %v2318_v43  ;;  %v2405_v42 = vld [vmem:[#allocation2 + $0x324] ss:$16 sps:$4 sm:$0xff]   ;;  %v2408_v43 = vld [vmem:[#allocation2 + $0x32c] ss:$16 sps:$4 sm:$0xff]  }
  0x3e   :  { %1274 = vmatprep.subr.bf16.mxu0 %v2319_v44  ;;  %1438 = vmatprep.subr.bf16.mxu1 %v2321_v45  ;;  %v2403_v44 = vld [vmem:[#allocation2 + $0x320] ss:$16 sps:$4 sm:$0xff]   ;;  %v2406_v45 = vld [vmem:[#allocation2 + $0x328] ss:$16 sps:$4 sm:$0xff]  }
  0x41   :  { %1275 = vmatpush1.bf16.msra.mxu0 %v2323_v47  ;;  %1439 = vmatpush1.bf16.msra.mxu1 %v2324_v49  ;;  %v2414_v47 = vld [vmem:[#allocation2 + $0x34c] ss:$16 sps:$4 sm:$0xff]   ;;  %v2412_v49 = vld [vmem:[#allocation2 + $0x348] ss:$16 sps:$4 sm:$0xff]  }
  0x42   :  { %1276 = vmatprep.subr.bf16.mxu0 %v2325_v50  ;;  %1440 = vmatprep.subr.bf16.mxu1 %v2327_v51  ;;  %v2417_v50 = vld [vmem:[#allocation2 + $0x364] ss:$16 sps:$4 sm:$0xff]   ;;  %v2420_v51 = vld [vmem:[#allocation2 + $0x36c] ss:$16 sps:$4 sm:$0xff]  }
  0x45   :  { %1277 = vmatpush1.bf16.msra.mxu0 %v2329_v52  ;;  %1441 = vmatpush1.bf16.msra.mxu1 %v2330_v53  ;;  %v2415_v52 = vld [vmem:[#allocation2 + $0x360] ss:$16 sps:$4 sm:$0xff]   ;;  %v2418_v53 = vld [vmem:[#allocation2 + $0x368] ss:$16 sps:$4 sm:$0xff]  }
  0x46   :  { %1278 = vmatprep.subr.bf16.mxu0 %v2331_v54  ;;  %1442 = vmatprep.subr.bf16.mxu1 %v2333_v55  ;;  %v2423_v54 = vld [vmem:[#allocation2 + $0x384] ss:$16 sps:$4 sm:$0xff]   ;;  %v2426_v55 = vld [vmem:[#allocation2 + $0x38c] ss:$16 sps:$4 sm:$0xff]  }
  0x49   :  { %1279 = vmatpush1.bf16.msra.mxu0 %v2335_v56  ;;  %1443 = vmatpush1.bf16.msra.mxu1 %v2336_v57  ;;  %v2421_v56 = vld [vmem:[#allocation2 + $0x380] ss:$16 sps:$4 sm:$0xff]   ;;  %v2424_v57 = vld [vmem:[#allocation2 + $0x388] ss:$16 sps:$4 sm:$0xff]  }
  0x4a   :  { %1280 = vmatprep.subr.bf16.mxu0 %v2337_v58  ;;  %1444 = vmatprep.subr.bf16.mxu1 %v2339_v59  ;;  %v2429_v58 = vld [vmem:[#allocation2 + $0x3a4] ss:$16 sps:$4 sm:$0xff]   ;;  %v2432_v59 = vld [vmem:[#allocation2 + $0x3ac] ss:$16 sps:$4 sm:$0xff]  }
  0x4d   :  { %1281 = vmatpush1.bf16.msra.mxu0 %v2341_v60  ;;  %1445 = vmatpush1.bf16.msra.mxu1 %v2342_v61  ;;  %v2427_v60 = vld [vmem:[#allocation2 + $0x3a0] ss:$16 sps:$4 sm:$0xff]   ;;  %v2430_v61 = vld [vmem:[#allocation2 + $0x3a8] ss:$16 sps:$4 sm:$0xff]  }
  0x4e   :  { %1282 = vmatprep.subr.bf16.mxu0 %v2343_v62  ;;  %1446 = vmatprep.subr.bf16.mxu1 %v2345_v63  ;;  %v2435_v62 = vld [vmem:[#allocation2 + $0x3c4] ss:$16 sps:$4 sm:$0xff]   ;;  %v2438_v63 = vld [vmem:[#allocation2 + $0x3cc] ss:$16 sps:$4 sm:$0xff]  }
  0x51   :  { %1283 = vmatpush1.bf16.msra.mxu0 %v2347_v0  ;;  %1447 = vmatpush1.bf16.msra.mxu1 %v2348_v1  ;;  %v2433_v0 = vld [vmem:[#allocation2 + $0x3c0] ss:$16 sps:$4 sm:$0xff]   ;;  %v2436_v1 = vld [vmem:[#allocation2 + $0x3c8] ss:$16 sps:$4 sm:$0xff]  }
  0x52   :  { %1293 = vmatprep.subr.bf16.mxu0 %v2351_v3  ;;  %1457 = vmatprep.subr.bf16.mxu1 %v2354_v4  ;;  %v2444_v3 = vld [vmem:[#allocation2 + $0x3ec] ss:$16 sps:$4 sm:$0xff]   ;;  %v2439_v4 = vld [vmem:[#allocation2 + $0x3e0] ss:$16 sps:$4 sm:$0xff]  }
  0x54   :  { %1285 = vmatmul.mubr.bf16.vlgmr.msra.gmra.mrb[0].mxu0 %v43_v5  ;;  %1449 = vmatmul.mubr.bf16.vlgmr.msra.gmra.mrb[0].mxu1 %v43_v5  ;;  %v2442_v5 = vld [vmem:[#allocation2 + $0x3e8] ss:$16 sps:$4 sm:$0xff]  }
  0x55   :  { %1294 = vmatpush1.bf16.msra.mxu0 %v2349_v6  ;;  %1458 = vmatpush1.bf16.msra.mxu1 %v2352_v7  ;;  %v2447_v6 = vld [vmem:[#allocation2 + $0x404] ss:$16 sps:$4 sm:$0xff]  }
  0x56   :  { %1295 = vmatprep.subr.bf16.mxu0 %v2357_v8  ;;  %1459 = vmatprep.subr.bf16.mxu1 %v2360_v9  ;;  %v38_v7 = vld [vmem:[%s2809_s0 + $0x10] sm:$0xff]  ;;  %v2450_v8 = vld [vmem:[#allocation2 + $0x40c] ss:$16 sps:$4 sm:$0xff]  }
  0x57   :  { %1325 = vmatprep.mubr.bf16.mxu0 %v46_v32  ;;  %1489 = vmatprep.mubr.bf16.mxu1 %v46_v32  ;;  %v2445_v9 = vld [vmem:[#allocation2 + $0x400] ss:$16 sps:$4 sm:$0xff]  }
  0x58   :  { %v2475_v32 = vld [vmem:[#allocation2 + $0x4a0] ss:$16 sps:$4 sm:$0xff]  }
  0x59   :  { %1296 = vmatpush1.bf16.msra.mxu0 %v2355_v10  ;;  %1460 = vmatpush1.bf16.msra.mxu1 %v2358_v11  ;;  %v45_v10 = vpack.c.bf16 %v38_v7, %v38_v7  ;;  %v2448_v11 = vld [vmem:[#allocation2 + $0x408] ss:$16 sps:$4 sm:$0xff]   ;;  %v2540_v7 = vld [vmem:[#allocation2 + $0x5ec] ss:$16 sps:$4 sm:$0xff]  }
  0x5a   :  { %1297 = vmatprep.subr.bf16.mxu0 %v2363_v12  ;;  %1461 = vmatprep.subr.bf16.mxu1 %v2366_v13  ;;  %v2453_v12 = vld [vmem:[#allocation2 + $0x424] ss:$16 sps:$4 sm:$0xff]   ;;  %v2456_v13 = vld [vmem:[#allocation2 + $0x42c] ss:$16 sps:$4 sm:$0xff]  }
  0x5d   :  { %1298 = vmatpush1.bf16.msra.mxu0 %v2361_v14  ;;  %1462 = vmatpush1.bf16.msra.mxu1 %v2364_v15  ;;  %v41_v14 = vld [vmem:[%s2809_s0 + $0x28] sm:$0xff] }
  0x5e   :  { %1299 = vmatprep.subr.bf16.mxu0 %v2369_v16  ;;  %1463 = vmatprep.subr.bf16.mxu1 %v2372_v17  ;;  %v48_v15 = vpack.c.bf16 %v41_v14, %v41_v14  ;;  %v2451_v16 = vld [vmem:[#allocation2 + $0x420] ss:$16 sps:$4 sm:$0xff]   ;;  %v2454_v17 = vld [vmem:[#allocation2 + $0x428] ss:$16 sps:$4 sm:$0xff]  }
  0x5f   :  { %v2541_v14 = vld [vmem:[#allocation2 + $0x600] ss:$16 sps:$4 sm:$0xff]  }
  0x61   :  { %1300 = vmatpush1.bf16.msra.mxu0 %v2367_v18  ;;  %1464 = vmatpush1.bf16.msra.mxu1 %v2370_v19  ;;  %v2459_v18 = vld [vmem:[#allocation2 + $0x444] ss:$16 sps:$4 sm:$0xff]   ;;  %v2462_v19 = vld [vmem:[#allocation2 + $0x44c] ss:$16 sps:$4 sm:$0xff]  }
  0x62   :  { %1301 = vmatprep.subr.bf16.mxu0 %v2375_v20  ;;  %1465 = vmatprep.subr.bf16.mxu1 %v2378_v21  ;;  %v2457_v20 = vld [vmem:[#allocation2 + $0x440] ss:$16 sps:$4 sm:$0xff]   ;;  %v2460_v21 = vld [vmem:[#allocation2 + $0x448] ss:$16 sps:$4 sm:$0xff]  }
  0x65   :  { %1302 = vmatpush1.bf16.msra.mxu0 %v2373_v22  ;;  %1466 = vmatpush1.bf16.msra.mxu1 %v2376_v23  ;;  %v2465_v22 = vld [vmem:[#allocation2 + $0x464] ss:$16 sps:$4 sm:$0xff]   ;;  %v2468_v23 = vld [vmem:[#allocation2 + $0x46c] ss:$16 sps:$4 sm:$0xff]  }
  0x66   :  { %1303 = vmatprep.subr.bf16.mxu0 %v2381_v24  ;;  %1467 = vmatprep.subr.bf16.mxu1 %v2384_v25  ;;  %v2463_v24 = vld [vmem:[#allocation2 + $0x460] ss:$16 sps:$4 sm:$0xff]   ;;  %v2466_v25 = vld [vmem:[#allocation2 + $0x468] ss:$16 sps:$4 sm:$0xff]  }
  0x69   :  { %1304 = vmatpush1.bf16.msra.mxu0 %v2379_v26  ;;  %1468 = vmatpush1.bf16.msra.mxu1 %v2382_v27  ;;  %v2471_v26 = vld [vmem:[#allocation2 + $0x484] ss:$16 sps:$4 sm:$0xff]   ;;  %v2474_v27 = vld [vmem:[#allocation2 + $0x48c] ss:$16 sps:$4 sm:$0xff]  }
  0x6a   :  { %1305 = vmatprep.subr.bf16.mxu0 %v2387_v28  ;;  %1469 = vmatprep.subr.bf16.mxu1 %v2390_v29  ;;  %v2469_v28 = vld [vmem:[#allocation2 + $0x480] ss:$16 sps:$4 sm:$0xff]   ;;  %v2472_v29 = vld [vmem:[#allocation2 + $0x488] ss:$16 sps:$4 sm:$0xff]  }
  0x6d   :  { %1306 = vmatpush1.bf16.msra.mxu0 %v2385_v31  ;;  %1470 = vmatpush1.bf16.msra.mxu1 %v2388_v33  ;;  %v2480_v31 = vld [vmem:[#allocation2 + $0x4ac] ss:$16 sps:$4 sm:$0xff]   ;;  %v2478_v33 = vld [vmem:[#allocation2 + $0x4a8] ss:$16 sps:$4 sm:$0xff]  }
  0x6e   :  { %1307 = vmatprep.subr.bf16.mxu0 %v2393_v34  ;;  %1471 = vmatprep.subr.bf16.mxu1 %v2396_v35  ;;  %v2483_v34 = vld [vmem:[#allocation2 + $0x4c4] ss:$16 sps:$4 sm:$0xff]   ;;  %v2486_v35 = vld [vmem:[#allocation2 + $0x4cc] ss:$16 sps:$4 sm:$0xff]  }
  0x71   :  { %1308 = vmatpush1.bf16.msra.mxu0 %v2391_v36  ;;  %1472 = vmatpush1.bf16.msra.mxu1 %v2394_v37  ;;  %v2481_v36 = vld [vmem:[#allocation2 + $0x4c0] ss:$16 sps:$4 sm:$0xff]   ;;  %v2484_v37 = vld [vmem:[#allocation2 + $0x4c8] ss:$16 sps:$4 sm:$0xff]  }
  0x72   :  { %1309 = vmatprep.subr.bf16.mxu0 %v2399_v38  ;;  %1473 = vmatprep.subr.bf16.mxu1 %v2402_v39  ;;  %v2489_v38 = vld [vmem:[#allocation2 + $0x4e4] ss:$16 sps:$4 sm:$0xff]   ;;  %v2492_v39 = vld [vmem:[#allocation2 + $0x4ec] ss:$16 sps:$4 sm:$0xff]  }
  0x75   :  { %1310 = vmatpush1.bf16.msra.mxu0 %v2397_v40  ;;  %1474 = vmatpush1.bf16.msra.mxu1 %v2400_v41  ;;  %v2487_v40 = vld [vmem:[#allocation2 + $0x4e0] ss:$16 sps:$4 sm:$0xff]   ;;  %v2490_v41 = vld [vmem:[#allocation2 + $0x4e8] ss:$16 sps:$4 sm:$0xff]  }
  0x76   :  { %1311 = vmatprep.subr.bf16.mxu0 %v2405_v42  ;;  %1475 = vmatprep.subr.bf16.mxu1 %v2408_v43  ;;  %v2495_v42 = vld [vmem:[#allocation2 + $0x504] ss:$16 sps:$4 sm:$0xff]   ;;  %v2498_v43 = vld [vmem:[#allocation2 + $0x50c] ss:$16 sps:$4 sm:$0xff]  }
  0x79   :  { %1312 = vmatpush1.bf16.msra.mxu0 %v2403_v44  ;;  %1476 = vmatpush1.bf16.msra.mxu1 %v2406_v45  ;;  %v2493_v44 = vld [vmem:[#allocation2 + $0x500] ss:$16 sps:$4 sm:$0xff]   ;;  %v2496_v45 = vld [vmem:[#allocation2 + $0x508] ss:$16 sps:$4 sm:$0xff]  }
  0x7a   :  { %1313 = vmatprep.subr.bf16.mxu0 %v2411_v46  ;;  %1477 = vmatprep.subr.bf16.mxu1 %v2414_v47  ;;  %v2501_v46 = vld [vmem:[#allocation2 + $0x524] ss:$16 sps:$4 sm:$0xff]   ;;  %v2504_v47 = vld [vmem:[#allocation2 + $0x52c] ss:$16 sps:$4 sm:$0xff]  }
  0x7d   :  { %1314 = vmatpush1.bf16.msra.mxu0 %v2409_v48  ;;  %1478 = vmatpush1.bf16.msra.mxu1 %v2412_v49  ;;  %v2499_v48 = vld [vmem:[#allocation2 + $0x520] ss:$16 sps:$4 sm:$0xff]   ;;  %v2502_v49 = vld [vmem:[#allocation2 + $0x528] ss:$16 sps:$4 sm:$0xff]  }
  0x7e   :  { %1315 = vmatprep.subr.bf16.mxu0 %v2417_v50  ;;  %1479 = vmatprep.subr.bf16.mxu1 %v2420_v51  ;;  %v2507_v50 = vld [vmem:[#allocation2 + $0x544] ss:$16 sps:$4 sm:$0xff]   ;;  %v2510_v51 = vld [vmem:[#allocation2 + $0x54c] ss:$16 sps:$4 sm:$0xff]  }
  0x81   :  { %1316 = vmatpush1.bf16.msra.mxu0 %v2415_v52  ;;  %1480 = vmatpush1.bf16.msra.mxu1 %v2418_v53  ;;  %v2505_v52 = vld [vmem:[#allocation2 + $0x540] ss:$16 sps:$4 sm:$0xff]   ;;  %v2508_v53 = vld [vmem:[#allocation2 + $0x548] ss:$16 sps:$4 sm:$0xff]  }
  0x82   :  { %1317 = vmatprep.subr.bf16.mxu0 %v2423_v54  ;;  %1481 = vmatprep.subr.bf16.mxu1 %v2426_v55  ;;  %v2513_v54 = vld [vmem:[#allocation2 + $0x564] ss:$16 sps:$4 sm:$0xff]   ;;  %v2516_v55 = vld [vmem:[#allocation2 + $0x56c] ss:$16 sps:$4 sm:$0xff]  }
  0x85   :  { %1318 = vmatpush1.bf16.msra.mxu0 %v2421_v56  ;;  %1482 = vmatpush1.bf16.msra.mxu1 %v2424_v57  ;;  %v2511_v56 = vld [vmem:[#allocation2 + $0x560] ss:$16 sps:$4 sm:$0xff]   ;;  %v2514_v57 = vld [vmem:[#allocation2 + $0x568] ss:$16 sps:$4 sm:$0xff]  }
  0x86   :  { %1319 = vmatprep.subr.bf16.mxu0 %v2429_v58  ;;  %1483 = vmatprep.subr.bf16.mxu1 %v2432_v59  ;;  %v2519_v58 = vld [vmem:[#allocation2 + $0x584] ss:$16 sps:$4 sm:$0xff]   ;;  %v2522_v59 = vld [vmem:[#allocation2 + $0x58c] ss:$16 sps:$4 sm:$0xff]  }
  0x89   :  { %1320 = vmatpush1.bf16.msra.mxu0 %v2427_v60  ;;  %1484 = vmatpush1.bf16.msra.mxu1 %v2430_v61  ;;  %v2517_v60 = vld [vmem:[#allocation2 + $0x580] ss:$16 sps:$4 sm:$0xff]   ;;  %v2520_v61 = vld [vmem:[#allocation2 + $0x588] ss:$16 sps:$4 sm:$0xff]  }
  0x8a   :  { %1321 = vmatprep.subr.bf16.mxu0 %v2435_v62  ;;  %1485 = vmatprep.subr.bf16.mxu1 %v2438_v63  ;;  %v2525_v62 = vld [vmem:[#allocation2 + $0x5a4] ss:$16 sps:$4 sm:$0xff]   ;;  %v2528_v63 = vld [vmem:[#allocation2 + $0x5ac] ss:$16 sps:$4 sm:$0xff]  }
  0x8d   :  { %1322 = vmatpush1.bf16.msra.mxu0 %v2433_v0  ;;  %1486 = vmatpush1.bf16.msra.mxu1 %v2436_v1  ;;  %v2523_v0 = vld [vmem:[#allocation2 + $0x5a0] ss:$16 sps:$4 sm:$0xff]   ;;  %v2526_v1 = vld [vmem:[#allocation2 + $0x5a8] ss:$16 sps:$4 sm:$0xff]  }
  0x8e   :  { %1323 = vmatprep.subr.bf16.mxu0 %v2441_v2  ;;  %1487 = vmatprep.subr.bf16.mxu1 %v2444_v3  ;;  %v2531_v2 = vld [vmem:[#allocation2 + $0x5c4] ss:$16 sps:$4 sm:$0xff]   ;;  %v2534_v3 = vld [vmem:[#allocation2 + $0x5cc] ss:$16 sps:$4 sm:$0xff]  }
  0x91   :  { %1324 = vmatpush1.bf16.msra.mxu0 %v2439_v4  ;;  %1488 = vmatpush1.bf16.msra.mxu1 %v2442_v5  ;;  %v2529_v4 = vld [vmem:[#allocation2 + $0x5c0] ss:$16 sps:$4 sm:$0xff]   ;;  %v2532_v5 = vld [vmem:[#allocation2 + $0x5c8] ss:$16 sps:$4 sm:$0xff]  }
  0x92   :  { %1334 = vmatprep.subr.bf16.mxu0 %v2447_v6  ;;  %1498 = vmatprep.subr.bf16.mxu1 %v2450_v8  ;;  %v2537_v6 = vld [vmem:[#allocation2 + $0x5e4] ss:$16 sps:$4 sm:$0xff]   ;;  %v2535_v8 = vld [vmem:[#allocation2 + $0x5e0] ss:$16 sps:$4 sm:$0xff]  }
  0x94   :  { %1326 = vmatmul.mubr.bf16.vlgmr.msra.gmra.mrb[0].mxu0 %v45_v10  ;;  %1490 = vmatmul.mubr.bf16.vlgmr.msra.gmra.mrb[0].mxu1 %v45_v10  ;;  %v40_v10 = vld [vmem:[%s2809_s0 + $0x20] sm:$0xff] }
  0x95   :  { %1335 = vmatpush1.bf16.msra.mxu0 %v2445_v9  ;;  %1499 = vmatpush1.bf16.msra.mxu1 %v2448_v11  ;;  %v2538_v9 = vld [vmem:[#allocation2 + $0x5e8] ss:$16 sps:$4 sm:$0xff]   ;;  %v2543_v11 = vld [vmem:[#allocation2 + $0x604] ss:$16 sps:$4 sm:$0xff]  }
  0x96   :  { %1336 = vmatprep.subr.bf16.mxu0 %v2453_v12  ;;  %1500 = vmatprep.subr.bf16.mxu1 %v2456_v13  ;;  %v2546_v12 = vld [vmem:[#allocation2 + $0x60c] ss:$16 sps:$4 sm:$0xff]   ;;  %v47_v13 = vpack.c.bf16 %v40_v10, %v40_v10 }
  0x97   :  { %1366 = vmatprep.mubr.bf16.mxu0 %v48_v15  ;;  %1530 = vmatprep.mubr.bf16.mxu1 %v48_v15  ;;  %v2544_v15 = vld [vmem:[#allocation2 + $0x608] ss:$16 sps:$4 sm:$0xff]  }
  0x99   :  { %1337 = vmatpush1.bf16.msra.mxu0 %v2451_v16  ;;  %1501 = vmatpush1.bf16.msra.mxu1 %v2454_v17  ;;  %v2547_v16 = vld [vmem:[%s2812_s3 + $0x40] sm:$0xff]  }
  0x9a   :  { %1338 = vmatprep.subr.bf16.mxu0 %v2459_v18  ;;  %1502 = vmatprep.subr.bf16.mxu1 %v2462_v19  ;;  %v2548_v17 = vld [vmem:[%s2812_s3 + $0xc0] sm:$0xff]   ;;  %v2630_v18 = vmov 0   ;;  %v42_v19 = vld [vmem:[%s2809_s0 + $0x30] sm:$0xff]  ;;  %s2631_s0 = smov [#allocation5]  }
  0x9b   :  { %s1936_s1 = sshll.u32 %s2631_s0, 4  ;;  %s1937_s1 = int_to_ptr.vmem [resolvable:$true] %s1936_s1 }
  0x9c   :  { %s2601_s7 = scalar_lea.vmem %s1937_s1, 128  ;;  %p2606_p9 = scmp.lt.s32.totalorder %s1937_s1, %s1937_s1 }
  0x9d   :  { %1339 = vmatpush1.bf16.msra.mxu0 %v2457_v20  ;;  %1503 = vmatpush1.bf16.msra.mxu1 %v2460_v21  ;;  %v49_v20 = vpack.c.bf16 %v42_v19, %v42_v19  ;;  %v2549_v21 = vld [vmem:[%s2812_s3] sm:$0xff]   ;;  %p2602_p8 = scmp.ne.s32.totalorder %s1937_s1, %s2601_s7  ;;  %p2607_p10 = scmp.lt.s32.totalorder %s2601_s7, %s2601_s7 }
  0x9e   :  { %1340 = vmatprep.subr.bf16.mxu0 %v2465_v22  ;;  %1504 = vmatprep.subr.bf16.mxu1 %v2468_v23  ;;  %v2550_v22 = vld [vmem:[%s2812_s3 + $0x80] sm:$0xff]   ;;  %v2551_v23 = vld [vmem:[%s2812_s3 + $0x48] sm:$0xff]  }
  0x9f   :  { %p2608_p11 = por %p2607_p10, %p2606_p9 }
  0xa1   :  { %1341 = vmatpush1.bf16.msra.mxu0 %v2463_v24  ;;  %1505 = vmatpush1.bf16.msra.mxu1 %v2466_v25  ;;  %v2552_v24 = vld [vmem:[%s2812_s3 + $0xc8] sm:$0xff]   ;;  %p2609_p12 = pnand %p2608_p11, %p2602_p8 }
  0xa2   :  { %1342 = vmatprep.subr.bf16.mxu0 %v2471_v26  ;;  %1506 = vmatprep.subr.bf16.mxu1 %v2474_v27  ;;  %v2553_v25 = vld [vmem:[%s2812_s3 + $0x8] sm:$0xff]   ;;  %v2555_v27 = vld [vmem:[%s2812_s3 + $0x50] sm:$0xff]  }
  0xa3   :  { %v2554_v26 = vld [vmem:[%s2812_s3 + $0x88] sm:$0xff]  }
  0xa5   :  { %1343 = vmatpush1.bf16.msra.mxu0 %v2469_v28  ;;  %1507 = vmatpush1.bf16.msra.mxu1 %v2472_v29  ;;  %v2556_v28 = vld [vmem:[%s2812_s3 + $0xd0] sm:$0xff]  }
  0xa6   :  { %1344 = vmatprep.subr.bf16.mxu0 %v2477_v30  ;;  %1508 = vmatprep.subr.bf16.mxu1 %v2480_v31  ;;  %v2557_v29 = vld [vmem:[%s2812_s3 + $0x10] sm:$0xff]   ;;  %v2559_v31 = vld [vmem:[%s2812_s3 + $0x58] sm:$0xff]  }
  0xa7   :  { %v2558_v30 = vld [vmem:[%s2812_s3 + $0x90] sm:$0xff]  }
  0xa9   :  { %1345 = vmatpush1.bf16.msra.mxu0 %v2475_v32  ;;  %1509 = vmatpush1.bf16.msra.mxu1 %v2478_v33  ;;  %v2560_v32 = vld [vmem:[%s2812_s3 + $0xd8] sm:$0xff]  }
  0xaa   :  { %1346 = vmatprep.subr.bf16.mxu0 %v2483_v34  ;;  %1510 = vmatprep.subr.bf16.mxu1 %v2486_v35  ;;  %v2561_v33 = vld [vmem:[%s2812_s3 + $0x18] sm:$0xff]   ;;  %v2563_v35 = vld [vmem:[%s2812_s3 + $0x60] sm:$0xff]  }
  0xab   :  { %v2562_v34 = vld [vmem:[%s2812_s3 + $0x98] sm:$0xff]  }
  0xad   :  { %1347 = vmatpush1.bf16.msra.mxu0 %v2481_v36  ;;  %1511 = vmatpush1.bf16.msra.mxu1 %v2484_v37  ;;  %v2564_v36 = vld [vmem:[%s2812_s3 + $0xe0] sm:$0xff]  }
  0xae   :  { %1348 = vmatprep.subr.bf16.mxu0 %v2489_v38  ;;  %1512 = vmatprep.subr.bf16.mxu1 %v2492_v39  ;;  %v2565_v37 = vld [vmem:[%s2812_s3 + $0x20] sm:$0xff]   ;;  %v2567_v39 = vld [vmem:[%s2812_s3 + $0x68] sm:$0xff]  }
  0xaf   :  { %v2566_v38 = vld [vmem:[%s2812_s3 + $0xa0] sm:$0xff]  }
  0xb1   :  { %1349 = vmatpush1.bf16.msra.mxu0 %v2487_v40  ;;  %1513 = vmatpush1.bf16.msra.mxu1 %v2490_v41  ;;  %v2568_v40 = vld [vmem:[%s2812_s3 + $0xe8] sm:$0xff]  }
  0xb2   :  { %1350 = vmatprep.subr.bf16.mxu0 %v2495_v42  ;;  %1514 = vmatprep.subr.bf16.mxu1 %v2498_v43  ;;  %v2569_v41 = vld [vmem:[%s2812_s3 + $0x28] sm:$0xff]   ;;  %v2571_v43 = vld [vmem:[%s2812_s3 + $0x70] sm:$0xff]  }
  0xb3   :  { %v2570_v42 = vld [vmem:[%s2812_s3 + $0xa8] sm:$0xff]  }
  0xb5   :  { %1351 = vmatpush1.bf16.msra.mxu0 %v2493_v44  ;;  %1515 = vmatpush1.bf16.msra.mxu1 %v2496_v45  ;;  %v2572_v44 = vld [vmem:[%s2812_s3 + $0xf0] sm:$0xff]  }
  0xb6   :  { %1352 = vmatprep.subr.bf16.mxu0 %v2501_v46  ;;  %1516 = vmatprep.subr.bf16.mxu1 %v2504_v47  ;;  %v2573_v45 = vld [vmem:[%s2812_s3 + $0x30] sm:$0xff]   ;;  %v2575_v47 = vld [vmem:[%s2812_s3 + $0x78] sm:$0xff]  }
  0xb7   :  { %v2574_v46 = vld [vmem:[%s2812_s3 + $0xb0] sm:$0xff]  }
  0xb9   :  { %1353 = vmatpush1.bf16.msra.mxu0 %v2499_v48  ;;  %1517 = vmatpush1.bf16.msra.mxu1 %v2502_v49  ;;  %v2576_v48 = vld [vmem:[%s2812_s3 + $0xf8] sm:$0xff]  }
  0xba   :  { %1354 = vmatprep.subr.bf16.mxu0 %v2507_v50  ;;  %1518 = vmatprep.subr.bf16.mxu1 %v2510_v51  ;;  %v2577_v49 = vld [vmem:[%s2812_s3 + $0x38] sm:$0xff]   ;;  %v248_v51 = vlaneseq }
  0xbb   :  { %v2578_v50 = vld [vmem:[%s2812_s3 + $0xb8] sm:$0xff]  }
  0xbd   :  { %1355 = vmatpush1.bf16.msra.mxu0 %v2505_v52  ;;  %1519 = vmatpush1.bf16.msra.mxu1 %v2508_v53  ;;  %v249_v52 = vshrl.u32 %v248_v51, 7 }
  0xbe   :  { %1356 = vmatprep.subr.bf16.mxu0 %v2513_v54  ;;  %1520 = vmatprep.subr.bf16.mxu1 %v2516_v55  ;;  %v246_v55 = vld [vmem:[%s2811_s2] sm:$0xf] }
  0xbf   :  { %v250_v53 = vsub.s32 0, %v249_v52  ;;  %v258_v54 = vsub.s32 2, %v249_v52 }
  0xc1   :  { %1357 = vmatpush1.bf16.msra.mxu0 %v2511_v56  ;;  %1521 = vmatpush1.bf16.msra.mxu1 %v2514_v57  ;;  %v254_v56 = vsub.s32 1, %v249_v52  ;;  %v262_v57 = vsub.s32 3, %v249_v52 }
  0xc2   :  { %1358 = vmatprep.subr.bf16.mxu0 %v2519_v58  ;;  %1522 = vmatprep.subr.bf16.mxu1 %v2522_v59  ;;  %v251_v58 = vrot.slane %v246_v55, %v250_v53  ;;  %v259_v59 = vrot.slane %v246_v55, %v258_v54 }
  0xc5   :  { %1359 = vmatpush1.bf16.msra.mxu0 %v2517_v60  ;;  %1523 = vmatpush1.bf16.msra.mxu1 %v2520_v61  ;;  %v255_v60 = vrot.slane %v246_v55, %v254_v56  ;;  %v263_v61 = vrot.slane %v246_v55, %v262_v57 }
  0xc6   :  { %1360 = vmatprep.subr.bf16.mxu0 %v2525_v62  ;;  %1524 = vmatprep.subr.bf16.mxu1 %v2528_v63 }
  0xc9   :  { %1361 = vmatpush1.bf16.msra.mxu0 %v2523_v0  ;;  %1525 = vmatpush1.bf16.msra.mxu1 %v2526_v1 }
  0xca   :  { %1362 = vmatprep.subr.bf16.mxu0 %v2531_v2  ;;  %1526 = vmatprep.subr.bf16.mxu1 %v2534_v3 }
  0xcd   :  { %1363 = vmatpush1.bf16.msra.mxu0 %v2529_v4  ;;  %1527 = vmatpush1.bf16.msra.mxu1 %v2532_v5 }
  0xce   :  { %1364 = vmatprep.subr.bf16.mxu0 %v2537_v6  ;;  %1528 = vmatprep.subr.bf16.mxu1 %v2540_v7 }
  0xd1   :  { %1365 = vmatpush1.bf16.msra.mxu0 %v2535_v8  ;;  %1529 = vmatpush1.bf16.msra.mxu1 %v2538_v9 }
  0xd2   :  { %1375 = vmatprep.subr.bf16.mxu0 %v2543_v11  ;;  %1539 = vmatprep.subr.bf16.mxu1 %v2546_v12 }
  0xd4   :  { %1367 = vmatmul.mubr.bf16.vlgmr.msra.gmra.mrb[0].mxu0 %v47_v13  ;;  %1531 = vmatmul.mubr.bf16.vlgmr.msra.gmra.mrb[0].mxu1 %v47_v13 }
  0xd5   :  { %1376 = vmatpush1.bf16.msra.mxu0 %v2541_v14  ;;  %1540 = vmatpush1.bf16.msra.mxu1 %v2544_v15 }
  0xd6   :  { %1407 = vmatprep.mubr.bf16.mxu0 %v2630_v18  ;;  %1571 = vmatprep.mubr.bf16.mxu1 %v2630_v18 }
  0xd7   :  { %2176 = vmatprep.subr.bf16.mxu0 %v2547_v16  ;;  %2198 = vmatprep.subr.bf16.mxu1 %v2548_v17  ;;  %v2143_v16 = vld [vmem:[%s2813_s4] ss:$0 sm:$0xff] }
  0xe0   :  { %2141 = vmatmul.mubr.msk.bf16.vlgmr.msra.gmra.mrb[0].mxu0 %vm1248_vm0, %v49_v20  ;;  %2142 = vmatmul.mubr.msk.bf16.vlgmr.msra.gmra.mrb[0].mxu1 %vm1248_vm0, %v49_v20 }
  0xe1   :  { %2177 = vmatpush3.bf16.msra.mxu0 %v2549_v21  ;;  %2199 = vmatpush3.bf16.msra.mxu1 %v2550_v22 }
  0xe2   :  { %2178 = vmatprep.subr.bf16.mxu0 %v2551_v23  ;;  %2200 = vmatprep.subr.bf16.mxu1 %v2552_v24 }
  0xe5   :  { %2179 = vmatpush3.bf16.msra.mxu0 %v2553_v25  ;;  %2201 = vmatpush3.bf16.msra.mxu1 %v2554_v26 }
  0xe6   :  { %2180 = vmatprep.subr.bf16.mxu0 %v2555_v27  ;;  %2202 = vmatprep.subr.bf16.mxu1 %v2556_v28 }
  0xe9   :  { %2181 = vmatpush3.bf16.msra.mxu0 %v2557_v29  ;;  %2203 = vmatpush3.bf16.msra.mxu1 %v2558_v30 }
  0xea   :  { %2182 = vmatprep.subr.bf16.mxu0 %v2559_v31  ;;  %2204 = vmatprep.subr.bf16.mxu1 %v2560_v32 }
  0xed   :  { %2183 = vmatpush3.bf16.msra.mxu0 %v2561_v33  ;;  %2205 = vmatpush3.bf16.msra.mxu1 %v2562_v34 }
  0xee   :  { %2184 = vmatprep.subr.bf16.mxu0 %v2563_v35  ;;  %2206 = vmatprep.subr.bf16.mxu1 %v2564_v36 }
  0xf1   :  { %2185 = vmatpush3.bf16.msra.mxu0 %v2565_v37  ;;  %2207 = vmatpush3.bf16.msra.mxu1 %v2566_v38 }
  0xf2   :  { %2186 = vmatprep.subr.bf16.mxu0 %v2567_v39  ;;  %2208 = vmatprep.subr.bf16.mxu1 %v2568_v40 }
  0xf5   :  { %2187 = vmatpush3.bf16.msra.mxu0 %v2569_v41  ;;  %2209 = vmatpush3.bf16.msra.mxu1 %v2570_v42 }
  0xf6   :  { %2188 = vmatprep.subr.bf16.mxu0 %v2571_v43  ;;  %2210 = vmatprep.subr.bf16.mxu1 %v2572_v44 }
  0xf9   :  { %2189 = vmatpush3.bf16.msra.mxu0 %v2573_v45  ;;  %2211 = vmatpush3.bf16.msra.mxu1 %v2574_v46 }
  0xfa   :  { %2190 = vmatprep.subr.bf16.mxu0 %v2575_v47  ;;  %2212 = vmatprep.subr.bf16.mxu1 %v2576_v48 }
  0xfd   :  { %2191 = vmatpush3.bf16.msra.mxu0 %v2577_v49  ;;  %2213 = vmatpush3.bf16.msra.mxu1 %v2578_v50 }
 0x1b3   :  { %v1409_v62 = vpop.f32.mrb[0].mxu0  ;;  %v1573_v63 = vpop.f32.mrb[0].mxu1 }
 0x1b4   :  { %v2220_v0 = vadd.f32 %v1409_v62, %v251_v58  ;;  %v2222_v1 = vadd.f32 %v1573_v63, %v259_v59  ;;  %v1411_v2 = vpop.f32.mrb[1].mxu0  ;;  %v1575_v3 = vpop.f32.mrb[1].mxu1 }
 0x1b5   :  { %v2221_v4 = vadd.f32 %v1411_v2, %v255_v60  ;;  %v2223_v5 = vadd.f32 %v1575_v3, %v263_v61  ;;  %v1413_v6 = vpop.f32.mrb[2].mxu0  ;;  %v1577_v7 = vpop.f32.mrb[2].mxu1 }
 0x1b6   :  { %v1414_v8 = vpop.f32.mrb[3].mxu0  ;;  %v1578_v9 = vpop.f32.mrb[3].mxu1  ;;  %v1580_v12 = vpack.c.bf16 %v2220_v0, %v2220_v0  ;;  %v1582_v13 = vpack.c.bf16 %v2222_v1, %v2222_v1 }
 0x1b7   :  { %v1581_v10 = vpack.c.bf16 %v2221_v4, %v2221_v4  ;;  %v1583_v11 = vpack.c.bf16 %v2223_v5, %v2223_v5 }
 0x1b9   :  { %1879 = vmatprep.mubr.bf16.mxu0 %v1581_v10  ;;  %1919 = vmatprep.mubr.bf16.mxu1 %v1583_v11 }
 0x1ba   :  { %1880 = vmatmul.mubr.bf16.vlgmr.msra.gmra.mrb[4].mxu0 %v1580_v12  ;;  %1920 = vmatmul.mubr.bf16.vlgmr.msra.gmra.mrb[4].mxu1 %v1582_v13 }
 0x28d   :  { %v2192_v14 = vpop.f32.mrb[4].mxu0  ;;  %v2214_v15 = vpop.f32.mrb[4].mxu1 }
 0x28e   :  { %v2193_v17 = vpop.f32.mrb[5].mxu0  ;;  %v2215_v18 = vpop.f32.mrb[5].mxu1 }
 0x28f   :  { %v2194_v19 = vadd.f32 %v2193_v17, %v2192_v14  ;;  %v2216_v20 = vadd.f32 %v2215_v18, %v2214_v15  ;;  %v2195_v21 = vpop.f32.mrb[6].mxu0  ;;  %v2217_v22 = vpop.f32.mrb[6].mxu1 }
 0x290   :  { %v2196_v23 = vpop.f32.mrb[7].mxu0  ;;  %v2218_v24 = vpop.f32.mrb[7].mxu1 }
 0x291   :  { %v1882_v25 = vadd.f32 %v2194_v19, %v2143_v16 }
 0x293   :  { %v1922_v26 = vadd.f32 %v2216_v20, %v1882_v25 }
 0x295   :  { %v1927_v27 = vmax.f32 %v1922_v26, 0.0 }
 0x297   :  { %1929 = vst.msk [vmem:[#allocation5] sm:$0xff] %vm1928_vm1, %v1927_v27 }
 0x298   :  { %2612 = shalt.err (!%p2609_p12)
}
 0x299   :  { %s2613_s9 = scalar_lea.hbm %s2814_s5, 128 }
 0x29a   :  { %p2614_p13 = scmp.ne.s32.totalorder %s2814_s5, %s2613_s9  ;;  %p2617_p0 = scmp.lt.u32.totalorder %s2613_s9, %s2814_s5 }
 0x29c   :  { %p2619_p1 = pnand %p2617_p0, %p2614_p13 }
 0x29e   :  { %2622 = shalt.err (!%p2619_p1)
}
 0x29f   :  { %1939 = dma.vmem_to_hbm [thread:$0]  %s1937_s1, 128, %s2814_s5, [#allocation4]  }
 0x2a0   :  { %2625 = dma.done.wait [#allocation4], 128  }
 0x2a1   :  { %2626 = vsyncadd [#allocation4], 4294967168 }
 0x2a2   :  { %1943 = vsyncpa [#allocation3], 1 }
 0x2a3   :  { %1944 = vsyncpa [#allocation4], 1 }

</bundles_post_ra>
